<compile_context>
chip_gen: v7x
topology: tpu7x:2x2x1
jax: 0.10.0
libtpu: 0.0.40
codegen_flags: <defaults>
</compile_context>

<pallas_src>
import functools

import jax
import jax.numpy as jnp
from jax import lax
from jax.experimental import pallas as pl
from jax.experimental.pallas import tpu as pltpu

ALPHA = 0.03
RETURN_WEIGHT = 0.95
MOMENTUM_WEIGHT = 0.05   # kept for parity with the torch module; unused in forward()


def _sign_of_product_sum(a, b):
    """sum(sign(a) * sign(b)) computed as the sign of the product (VALU-cheap)."""
    p = a * b
    return jnp.sum(jnp.where(p > 0, 1.0, jnp.where(p < 0, -1.0, 0.0)))


def _ultra_return_boost_loss_kernel(pred_ref, ret_ref, out_ref, *, n, k, rows, cols):
    # pred_ref / ret_ref: (rows, cols) f32 in VMEM;  out_ref: (1, 1) f32 in SMEM.
    pred = pred_ref[...]
    ret = ret_ref[...]

    signals = jnp.tanh(pred)          # single tanh pass (EUP slot)
    pr = ret * signals                # portfolio returns, row-major sample order

    n_f = jnp.float32(n)
    nm1_f = jnp.float32(n - 1)
    k_f = jnp.float32(k)
    big = jnp.float32(3.0e38)

    # ---- fused single-sweep statistics over pr -----------------------------
    s1 = jnp.sum(pr)
    s2 = jnp.sum(pr * pr)
    s_abs = jnp.sum(jnp.abs(pr))
    s_pos = jnp.sum(jnp.where(pr > 0, 1.0, 0.0))
    s_large = jnp.sum(jnp.maximum(pr - 0.01, 0.0))

    mean_return = s1 / n_f
    # one-pass unbiased variance (matches torch.std(unbiased=True) to f32 noise)
    var = jnp.maximum((s2 - n_f * mean_return * mean_return) / nm1_f, 0.0)
    std_return = jnp.sqrt(var) + 1e-8
    sharpe_ratio = mean_return / std_return
    return_magnitude = s_abs / n_f
    positive_frequency = s_pos / n_f
    large_returns = s_large / n_f

    # ---- neighbour terms: within-row pairs + (rows-1) row-seam pairs -------
    # Flat sample index i lives at (i // cols, i % cols); its successor is the
    # next lane within the row, except at the row seam where it is (r+1, 0).
    mom_sum = jnp.float32(0.0)
    trend_sum = jnp.float32(0.0)
    sig_sum = jnp.float32(0.0)
    if cols > 1:
        a, b = pr[:, :cols - 1], pr[:, 1:]
        mom_sum = mom_sum + _sign_of_product_sum(a, b)
        trend_sum = trend_sum + jnp.sum(jnp.maximum(b - a, 0.0))
        sa, sb = signals[:, :cols - 1], signals[:, 1:]
        sig_sum = sig_sum + jnp.sum(jnp.abs(sb - sa))
    if rows > 1:
        a, b = pr[:rows - 1, cols - 1:], pr[1:, :1]
        mom_sum = mom_sum + _sign_of_product_sum(a, b)
        trend_sum = trend_sum + jnp.sum(jnp.maximum(b - a, 0.0))
        sa, sb = signals[:rows - 1, cols - 1:], signals[1:, :1]
        sig_sum = sig_sum + jnp.sum(jnp.abs(sb - sa))
    momentum_consistency = mom_sum / nm1_f
    trend_acceleration = trend_sum / nm1_f
    signal_changes = sig_sum / nm1_f

    # ---- CVaR: mean of the k smallest portfolio returns (exact) ------------
    if k <= 16:
        # unrolled min-and-remove: two cross-lane reductions per step, k steps.
        row_i = lax.broadcasted_iota(jnp.int32, (rows, cols), 0)
        col_i = lax.broadcasted_iota(jnp.int32, (rows, cols), 1)
        flat_i = row_i * cols + col_i
        work = pr
        acc = jnp.float32(0.0)
        for _ in range(k):
            m = jnp.min(work)
            acc = acc + m
            first = jnp.min(jnp.where(work == m, flat_i, jnp.int32(n)))
            work = jnp.where(flat_i == first, big, work)
        cvar = -acc / k_f
    else:
        # 32-step bisection on a monotone int32 key of the float bits; the
        # number of count-below reductions is independent of k.  Exact tie
        # handling at the threshold reproduces the sort-based mean.
        bits = pltpu.bitcast(pr, jnp.int32)
        key = jnp.where(bits >= 0, bits, bits ^ jnp.int32(0x7FFFFFFF))

        def _bisect(_, carry):
            lo, hi = carry
            mid = (lo & hi) + ((lo ^ hi) >> 1)          # overflow-safe midpoint
            cnt = jnp.sum(jnp.where(key <= mid, 1.0, 0.0))
            take = cnt >= k_f
            return jnp.where(take, lo, mid + 1), jnp.where(take, mid, hi)

        lo0 = jnp.int32(-(2 ** 31))
        hi0 = jnp.int32(2 ** 31 - 1)
        _, kth_key = lax.fori_loop(0, 32, _bisect, (lo0, hi0))
        lt = key < kth_key
        cnt_lt = jnp.sum(jnp.where(lt, 1.0, 0.0))
        sum_lt = jnp.sum(jnp.where(lt, pr, 0.0))
        kth_val = jnp.min(jnp.where(key == kth_key, pr, big))
        cvar = -(sum_lt + (k_f - cnt_lt) * kth_val) / k_f

    # ---- combine ------------------------------------------------------------
    return_components = (0.25 * sharpe_ratio
                         + 0.35 * return_magnitude
                         + 0.2 * positive_frequency
                         + 0.15 * large_returns
                         + 0.1 * momentum_consistency
                         + 0.08 * trend_acceleration)
    risk_penalties = 0.02 * cvar + 0.005 * signal_changes
    total_loss = -(RETURN_WEIGHT * return_components - risk_penalties)

    out_ref[0, 0] = total_loss


def ultra_return_boost_loss(predictions, returns, alpha=ALPHA):
    """predictions: (N, 1) or (N,) f32; returns: (N,) f32 -> scalar loss."""
    pred = jnp.asarray(predictions, jnp.float32).reshape(-1)
    ret = jnp.asarray(returns, jnp.float32).reshape(-1)
    n = pred.shape[0]
    assert n > 1, "kernel implements the len > 1 branch of the torch module"
    k = max(1, int(n * alpha))

    # Sublane packing: (8, N/8) keeps every f32 vreg fully populated.
    rows = 8 if n % 8 == 0 else 1
    cols = n // rows
    pred2 = pred.reshape(rows, cols)
    ret2 = ret.reshape(rows, cols)

    # For large N on v5e/v6e keep the single-block design and raise the scoped
    # VMEM limit.  (Never triggers at the small demo sizes.)
    # TODO(synk): for very large N on v7x (64 MiB VMEM, 2 TensorCores), switch
    # to a gridded streaming design with per-core partial sums.
    compiler_params = None
    resident = 2 * n * 4
    if resident > (8 << 20):
        compiler_params = pltpu.CompilerParams(
            vmem_limit_bytes=min(max(6 * resident, 32 << 20), 120 << 20))

    kernel = functools.partial(_ultra_return_boost_loss_kernel,
                               n=n, k=k, rows=rows, cols=cols)
    out = pl.pallas_call(
        kernel,
        out_shape=jax.ShapeDtypeStruct((1, 1), jnp.float32),
        in_specs=[pl.BlockSpec(memory_space=pltpu.MemorySpace.VMEM)] * 2,
        out_specs=pl.BlockSpec(memory_space=pltpu.MemorySpace.SMEM),
        compiler_params=compiler_params,
    )(pred2, ret2)
    return out[0, 0]


def _reference(predictions, returns, alpha=ALPHA):
    """Pure-JAX transcription of the torch forward (for validation)."""
    signals = jnp.tanh(predictions)
    pr = returns * jnp.squeeze(signals)
    mean_return = jnp.mean(pr)
    std_return = jnp.std(pr, ddof=1) + 1e-8
    sharpe = mean_return / std_return
    mag = jnp.mean(jnp.abs(pr))
    posfreq = jnp.mean((pr > 0).astype(jnp.float32))
    large = jnp.mean(jnp.maximum(pr - 0.01, 0.0))
    momentum = jnp.mean(jnp.sign(pr[1:]) * jnp.sign(pr[:-1]))
    trend = jnp.mean(jnp.maximum(pr[1:] - pr[:-1], 0.0))
    k = max(1, int(pr.shape[0] * alpha))
    cvar = -jnp.mean(jnp.sort(pr)[:k])
    sig = jnp.squeeze(signals)
    sig_changes = jnp.mean(jnp.abs(sig[1:] - sig[:-1]))
    rc = (0.25 * sharpe + 0.35 * mag + 0.2 * posfreq + 0.15 * large
          + 0.1 * momentum + 0.08 * trend)
    rp = 0.02 * cvar + 0.005 * sig_changes
    return -(RETURN_WEIGHT * rc - rp)


if __name__ == "__main__":
    key = jax.random.PRNGKey(0)
    # N=128 exercises the unrolled min-removal CVaR path (k=3);
    # N=1024 exercises the bisection CVaR path (k=30).
    for n in (128, 1024):
        key, kp, kr = jax.random.split(key, 3)
        predictions = jax.random.normal(kp, (n, 1), jnp.float32) * 0.5   # model outputs
        returns = jax.random.normal(kr, (n,), jnp.float32) * 0.02        # asset returns

        loss = jax.block_until_ready(ultra_return_boost_loss(predictions, returns))
        ref = _reference(predictions, returns)
        assert jnp.allclose(loss, ref, rtol=1e-4, atol=2e-5), (n, loss, ref)
    print("KERNEL_OK")
</pallas_src>

<mosaic_0001>
module attributes {stable_mosaic.version = 11 : i64} {
  func.func @_ultra_return_boost_loss_kernel(%arg0: memref<8x16xf32, #tpu.memory_space<vmem>>, %arg1: memref<8x16xf32, #tpu.memory_space<vmem>>, %arg2: memref<1x1xf32, #tpu.memory_space<smem>>) attributes {dimension_semantics = [], scalar_prefetch = 0 : i64, scratch_operands = 0 : i64, tpu.core_type = #tpu.core_type<tc>} {
    %c0 = arith.constant 0 : index
    %c0_0 = arith.constant 0 : index
    %0 = vector.load %arg0[%c0, %c0_0] : memref<8x16xf32, #tpu.memory_space<vmem>>, vector<8x16xf32>
    %c0_1 = arith.constant 0 : index
    %c0_2 = arith.constant 0 : index
    %1 = vector.load %arg1[%c0_1, %c0_2] : memref<8x16xf32, #tpu.memory_space<vmem>>, vector<8x16xf32>
    %2 = math.tanh %0 : vector<8x16xf32>
    %3 = arith.mulf %1, %2 : vector<8x16xf32>
    %4 = vector.shape_cast %3 : vector<8x16xf32> to vector<1x8x16xf32>
    %cst = arith.constant dense<0.000000e+00> : vector<1xf32>
    %5 = vector.multi_reduction <add>, %4, %cst [1, 2] : vector<1x8x16xf32> to vector<1xf32>
    %6 = vector.shape_cast %5 : vector<1xf32> to vector<1x1x1xf32>
    %7 = vector.extract %6[0, 0, 0] : f32 from vector<1x1x1xf32>
    %8 = arith.mulf %3, %3 : vector<8x16xf32>
    %9 = vector.shape_cast %8 : vector<8x16xf32> to vector<1x8x16xf32>
    %cst_3 = arith.constant dense<0.000000e+00> : vector<1xf32>
    %10 = vector.multi_reduction <add>, %9, %cst_3 [1, 2] : vector<1x8x16xf32> to vector<1xf32>
    %11 = vector.shape_cast %10 : vector<1xf32> to vector<1x1x1xf32>
    %12 = vector.extract %11[0, 0, 0] : f32 from vector<1x1x1xf32>
    %13 = math.absf %3 : vector<8x16xf32>
    %14 = vector.shape_cast %13 : vector<8x16xf32> to vector<1x8x16xf32>
    %cst_4 = arith.constant dense<0.000000e+00> : vector<1xf32>
    %15 = vector.multi_reduction <add>, %14, %cst_4 [1, 2] : vector<1x8x16xf32> to vector<1xf32>
    %16 = vector.shape_cast %15 : vector<1xf32> to vector<1x1x1xf32>
    %17 = vector.extract %16[0, 0, 0] : f32 from vector<1x1x1xf32>
    %cst_5 = arith.constant 0.000000e+00 : f32
    %18 = vector.broadcast %cst_5 : f32 to vector<8x16xf32>
    %19 = arith.cmpf ogt, %3, %18 : vector<8x16xf32>
    %cst_6 = arith.constant 1.000000e+00 : f32
    %cst_7 = arith.constant 0.000000e+00 : f32
    %20 = vector.broadcast %cst_6 : f32 to vector<8x16xf32>
    %21 = vector.broadcast %cst_7 : f32 to vector<8x16xf32>
    %22 = arith.select %19, %20, %21 : vector<8x16xi1>, vector<8x16xf32>
    %23 = vector.shape_cast %22 : vector<8x16xf32> to vector<1x8x16xf32>
    %cst_8 = arith.constant dense<0.000000e+00> : vector<1xf32>
    %24 = vector.multi_reduction <add>, %23, %cst_8 [1, 2] : vector<1x8x16xf32> to vector<1xf32>
    %25 = vector.shape_cast %24 : vector<1xf32> to vector<1x1x1xf32>
    %26 = vector.extract %25[0, 0, 0] : f32 from vector<1x1x1xf32>
    %cst_9 = arith.constant 0.00999999977 : f32
    %27 = vector.broadcast %cst_9 : f32 to vector<8x16xf32>
    %28 = arith.subf %3, %27 : vector<8x16xf32>
    %cst_10 = arith.constant 0.000000e+00 : f32
    %29 = vector.broadcast %cst_10 : f32 to vector<8x16xf32>
    %30 = arith.maximumf %28, %29 : vector<8x16xf32>
    %31 = vector.shape_cast %30 : vector<8x16xf32> to vector<1x8x16xf32>
    %cst_11 = arith.constant dense<0.000000e+00> : vector<1xf32>
    %32 = vector.multi_reduction <add>, %31, %cst_11 [1, 2] : vector<1x8x16xf32> to vector<1xf32>
    %33 = vector.shape_cast %32 : vector<1xf32> to vector<1x1x1xf32>
    %34 = vector.extract %33[0, 0, 0] : f32 from vector<1x1x1xf32>
    %cst_12 = arith.constant 1.280000e+02 : f32
    %35 = arith.divf %7, %cst_12 : f32
    %cst_13 = arith.constant 1.280000e+02 : f32
    %36 = arith.mulf %cst_13, %35 : f32
    %37 = arith.mulf %36, %35 : f32
    %38 = arith.subf %12, %37 : f32
    %cst_14 = arith.constant 1.270000e+02 : f32
    %39 = arith.divf %38, %cst_14 : f32
    %cst_15 = arith.constant 0.000000e+00 : f32
    %40 = arith.maximumf %39, %cst_15 : f32
    %41 = math.sqrt %40 : f32
    %cst_16 = arith.constant 9.99999993E-9 : f32
    %42 = arith.addf %41, %cst_16 : f32
    %43 = arith.divf %35, %42 : f32
    %cst_17 = arith.constant 1.280000e+02 : f32
    %44 = arith.divf %17, %cst_17 : f32
    %cst_18 = arith.constant 1.280000e+02 : f32
    %45 = arith.divf %26, %cst_18 : f32
    %cst_19 = arith.constant 1.280000e+02 : f32
    %46 = arith.divf %34, %cst_19 : f32
    %47 = vector.extract_strided_slice %3 {offsets = [0, 0], sizes = [8, 15], strides = [1, 1]} : vector<8x16xf32> to vector<8x15xf32>
    %48 = vector.extract_strided_slice %3 {offsets = [0, 1], sizes = [8, 15], strides = [1, 1]} : vector<8x16xf32> to vector<8x15xf32>
    %49 = arith.mulf %47, %48 : vector<8x15xf32>
    %cst_20 = arith.constant 0.000000e+00 : f32
    %50 = vector.broadcast %cst_20 : f32 to vector<8x15xf32>
    %51 = arith.cmpf ogt, %49, %50 : vector<8x15xf32>
    %cst_21 = arith.constant 0.000000e+00 : f32
    %52 = vector.broadcast %cst_21 : f32 to vector<8x15xf32>
    %53 = arith.cmpf olt, %49, %52 : vector<8x15xf32>
    %cst_22 = arith.constant -1.000000e+00 : f32
    %cst_23 = arith.constant 0.000000e+00 : f32
    %54 = vector.broadcast %cst_22 : f32 to vector<8x15xf32>
    %55 = vector.broadcast %cst_23 : f32 to vector<8x15xf32>
    %56 = arith.select %53, %54, %55 : vector<8x15xi1>, vector<8x15xf32>
    %cst_24 = arith.constant 1.000000e+00 : f32
    %57 = vector.broadcast %cst_24 : f32 to vector<8x15xf32>
    %58 = arith.select %51, %57, %56 : vector<8x15xi1>, vector<8x15xf32>
    %59 = vector.shape_cast %58 : vector<8x15xf32> to vector<1x8x15xf32>
    %cst_25 = arith.constant dense<0.000000e+00> : vector<1xf32>
    %60 = vector.multi_reduction <add>, %59, %cst_25 [1, 2] : vector<1x8x15xf32> to vector<1xf32>
    %61 = vector.shape_cast %60 : vector<1xf32> to vector<1x1x1xf32>
    %62 = vector.extract %61[0, 0, 0] : f32 from vector<1x1x1xf32>
    %cst_26 = arith.constant 0.000000e+00 : f32
    %63 = arith.addf %cst_26, %62 : f32
    %64 = arith.subf %48, %47 : vector<8x15xf32>
    %cst_27 = arith.constant 0.000000e+00 : f32
    %65 = vector.broadcast %cst_27 : f32 to vector<8x15xf32>
    %66 = arith.maximumf %64, %65 : vector<8x15xf32>
    %67 = vector.shape_cast %66 : vector<8x15xf32> to vector<1x8x15xf32>
    %cst_28 = arith.constant dense<0.000000e+00> : vector<1xf32>
    %68 = vector.multi_reduction <add>, %67, %cst_28 [1, 2] : vector<1x8x15xf32> to vector<1xf32>
    %69 = vector.shape_cast %68 : vector<1xf32> to vector<1x1x1xf32>
    %70 = vector.extract %69[0, 0, 0] : f32 from vector<1x1x1xf32>
    %cst_29 = arith.constant 0.000000e+00 : f32
    %71 = arith.addf %cst_29, %70 : f32
    %72 = vector.extract_strided_slice %2 {offsets = [0, 0], sizes = [8, 15], strides = [1, 1]} : vector<8x16xf32> to vector<8x15xf32>
    %73 = vector.extract_strided_slice %2 {offsets = [0, 1], sizes = [8, 15], strides = [1, 1]} : vector<8x16xf32> to vector<8x15xf32>
    %74 = arith.subf %73, %72 : vector<8x15xf32>
    %75 = math.absf %74 : vector<8x15xf32>
    %76 = vector.shape_cast %75 : vector<8x15xf32> to vector<1x8x15xf32>
    %cst_30 = arith.constant dense<0.000000e+00> : vector<1xf32>
    %77 = vector.multi_reduction <add>, %76, %cst_30 [1, 2] : vector<1x8x15xf32> to vector<1xf32>
    %78 = vector.shape_cast %77 : vector<1xf32> to vector<1x1x1xf32>
    %79 = vector.extract %78[0, 0, 0] : f32 from vector<1x1x1xf32>
    %cst_31 = arith.constant 0.000000e+00 : f32
    %80 = arith.addf %cst_31, %79 : f32
    %81 = vector.extract_strided_slice %3 {offsets = [0, 15], sizes = [7, 1], strides = [1, 1]} : vector<8x16xf32> to vector<7x1xf32>
    %82 = vector.extract_strided_slice %3 {offsets = [1, 0], sizes = [7, 1], strides = [1, 1]} : vector<8x16xf32> to vector<7x1xf32>
    %83 = arith.mulf %81, %82 : vector<7x1xf32>
    %cst_32 = arith.constant 0.000000e+00 : f32
    %84 = vector.broadcast %cst_32 : f32 to vector<7x1xf32>
    %85 = arith.cmpf ogt, %83, %84 : vector<7x1xf32>
    %cst_33 = arith.constant 0.000000e+00 : f32
    %86 = vector.broadcast %cst_33 : f32 to vector<7x1xf32>
    %87 = arith.cmpf olt, %83, %86 : vector<7x1xf32>
    %cst_34 = arith.constant -1.000000e+00 : f32
    %cst_35 = arith.constant 0.000000e+00 : f32
    %88 = vector.broadcast %cst_34 : f32 to vector<7x1xf32>
    %89 = vector.broadcast %cst_35 : f32 to vector<7x1xf32>
    %90 = arith.select %87, %88, %89 : vector<7x1xi1>, vector<7x1xf32>
    %cst_36 = arith.constant 1.000000e+00 : f32
    %91 = vector.broadcast %cst_36 : f32 to vector<7x1xf32>
    %92 = arith.select %85, %91, %90 : vector<7x1xi1>, vector<7x1xf32>
    %93 = vector.shape_cast %92 : vector<7x1xf32> to vector<1x7x1xf32>
    %cst_37 = arith.constant dense<0.000000e+00> : vector<1xf32>
    %94 = vector.multi_reduction <add>, %93, %cst_37 [1, 2] : vector<1x7x1xf32> to vector<1xf32>
    %95 = vector.shape_cast %94 : vector<1xf32> to vector<1x1x1xf32>
    %96 = vector.extract %95[0, 0, 0] : f32 from vector<1x1x1xf32>
    %97 = arith.addf %63, %96 : f32
    %98 = arith.subf %82, %81 : vector<7x1xf32>
    %cst_38 = arith.constant 0.000000e+00 : f32
    %99 = vector.broadcast %cst_38 : f32 to vector<7x1xf32>
    %100 = arith.maximumf %98, %99 : vector<7x1xf32>
    %101 = vector.shape_cast %100 : vector<7x1xf32> to vector<1x7x1xf32>
    %cst_39 = arith.constant dense<0.000000e+00> : vector<1xf32>
    %102 = vector.multi_reduction <add>, %101, %cst_39 [1, 2] : vector<1x7x1xf32> to vector<1xf32>
    %103 = vector.shape_cast %102 : vector<1xf32> to vector<1x1x1xf32>
    %104 = vector.extract %103[0, 0, 0] : f32 from vector<1x1x1xf32>
    %105 = arith.addf %71, %104 : f32
    %106 = vector.extract_strided_slice %2 {offsets = [0, 15], sizes = [7, 1], strides = [1, 1]} : vector<8x16xf32> to vector<7x1xf32>
    %107 = vector.extract_strided_slice %2 {offsets = [1, 0], sizes = [7, 1], strides = [1, 1]} : vector<8x16xf32> to vector<7x1xf32>
    %108 = arith.subf %107, %106 : vector<7x1xf32>
    %109 = math.absf %108 : vector<7x1xf32>
    %110 = vector.shape_cast %109 : vector<7x1xf32> to vector<1x7x1xf32>
    %cst_40 = arith.constant dense<0.000000e+00> : vector<1xf32>
    %111 = vector.multi_reduction <add>, %110, %cst_40 [1, 2] : vector<1x7x1xf32> to vector<1xf32>
    %112 = vector.shape_cast %111 : vector<1xf32> to vector<1x1x1xf32>
    %113 = vector.extract %112[0, 0, 0] : f32 from vector<1x1x1xf32>
    %114 = arith.addf %80, %113 : f32
    %cst_41 = arith.constant 1.270000e+02 : f32
    %115 = arith.divf %97, %cst_41 : f32
    %cst_42 = arith.constant 1.270000e+02 : f32
    %116 = arith.divf %105, %cst_42 : f32
    %cst_43 = arith.constant 1.270000e+02 : f32
    %117 = arith.divf %114, %cst_43 : f32
    %118 = tpu.iota {dimensions = array<i32: 0>} : vector<8x16xi32>
    %119 = tpu.iota {dimensions = array<i32: 1>} : vector<8x16xi32>
    %c16_i32 = arith.constant 16 : i32
    %120 = vector.broadcast %c16_i32 : i32 to vector<8x16xi32>
    %121 = arith.muli %118, %120 : vector<8x16xi32>
    %122 = arith.addi %121, %119 : vector<8x16xi32>
    %123 = vector.shape_cast %3 : vector<8x16xf32> to vector<1x8x16xf32>
    %cst_44 = arith.constant dense<0x7F800000> : vector<1xf32>
    %124 = vector.multi_reduction <minimumf>, %123, %cst_44 [1, 2] : vector<1x8x16xf32> to vector<1xf32>
    %125 = vector.shape_cast %124 : vector<1xf32> to vector<1x1x1xf32>
    %126 = vector.extract %125[0, 0, 0] : f32 from vector<1x1x1xf32>
    %cst_45 = arith.constant 0.000000e+00 : f32
    %127 = arith.addf %cst_45, %126 : f32
    %128 = vector.broadcast %126 : f32 to vector<8x16xf32>
    %129 = arith.cmpf oeq, %3, %128 : vector<8x16xf32>
    %c128_i32 = arith.constant 128 : i32
    %130 = vector.broadcast %c128_i32 : i32 to vector<8x16xi32>
    %131 = arith.select %129, %122, %130 : vector<8x16xi1>, vector<8x16xi32>
    %132 = vector.shape_cast %131 : vector<8x16xi32> to vector<1x8x16xi32>
    %cst_46 = arith.constant dense<2147483647> : vector<1xi32>
    %133 = vector.multi_reduction <minsi>, %132, %cst_46 [1, 2] : vector<1x8x16xi32> to vector<1xi32>
    %134 = vector.shape_cast %133 : vector<1xi32> to vector<1x1x1xi32>
    %135 = vector.extract %134[0, 0, 0] : i32 from vector<1x1x1xi32>
    %136 = vector.broadcast %135 : i32 to vector<8x16xi32>
    %137 = arith.cmpi eq, %122, %136 : vector<8x16xi32>
    %cst_47 = arith.constant 3.000000e+38 : f32
    %138 = vector.broadcast %cst_47 : f32 to vector<8x16xf32>
    %139 = arith.select %137, %138, %3 : vector<8x16xi1>, vector<8x16xf32>
    %140 = vector.shape_cast %139 : vector<8x16xf32> to vector<1x8x16xf32>
    %cst_48 = arith.constant dense<0x7F800000> : vector<1xf32>
    %141 = vector.multi_reduction <minimumf>, %140, %cst_48 [1, 2] : vector<1x8x16xf32> to vector<1xf32>
    %142 = vector.shape_cast %141 : vector<1xf32> to vector<1x1x1xf32>
    %143 = vector.extract %142[0, 0, 0] : f32 from vector<1x1x1xf32>
    %144 = arith.addf %127, %143 : f32
    %145 = vector.broadcast %143 : f32 to vector<8x16xf32>
    %146 = arith.cmpf oeq, %139, %145 : vector<8x16xf32>
    %c128_i32_49 = arith.constant 128 : i32
    %147 = vector.broadcast %c128_i32_49 : i32 to vector<8x16xi32>
    %148 = arith.select %146, %122, %147 : vector<8x16xi1>, vector<8x16xi32>
    %149 = vector.shape_cast %148 : vector<8x16xi32> to vector<1x8x16xi32>
    %cst_50 = arith.constant dense<2147483647> : vector<1xi32>
    %150 = vector.multi_reduction <minsi>, %149, %cst_50 [1, 2] : vector<1x8x16xi32> to vector<1xi32>
    %151 = vector.shape_cast %150 : vector<1xi32> to vector<1x1x1xi32>
    %152 = vector.extract %151[0, 0, 0] : i32 from vector<1x1x1xi32>
    %153 = vector.broadcast %152 : i32 to vector<8x16xi32>
    %154 = arith.cmpi eq, %122, %153 : vector<8x16xi32>
    %cst_51 = arith.constant 3.000000e+38 : f32
    %155 = vector.broadcast %cst_51 : f32 to vector<8x16xf32>
    %156 = arith.select %154, %155, %139 : vector<8x16xi1>, vector<8x16xf32>
    %157 = vector.shape_cast %156 : vector<8x16xf32> to vector<1x8x16xf32>
    %cst_52 = arith.constant dense<0x7F800000> : vector<1xf32>
    %158 = vector.multi_reduction <minimumf>, %157, %cst_52 [1, 2] : vector<1x8x16xf32> to vector<1xf32>
    %159 = vector.shape_cast %158 : vector<1xf32> to vector<1x1x1xf32>
    %160 = vector.extract %159[0, 0, 0] : f32 from vector<1x1x1xf32>
    %161 = arith.addf %144, %160 : f32
    %cst_53 = arith.constant 0.000000e+00 : f32
    %162 = arith.subf %cst_53, %161 : f32
    %cst_54 = arith.constant 3.000000e+00 : f32
    %163 = arith.divf %162, %cst_54 : f32
    %cst_55 = arith.constant 2.500000e-01 : f32
    %164 = arith.mulf %cst_55, %43 : f32
    %cst_56 = arith.constant 3.500000e-01 : f32
    %165 = arith.mulf %cst_56, %44 : f32
    %166 = arith.addf %164, %165 : f32
    %cst_57 = arith.constant 2.000000e-01 : f32
    %167 = arith.mulf %cst_57, %45 : f32
    %168 = arith.addf %166, %167 : f32
    %cst_58 = arith.constant 1.500000e-01 : f32
    %169 = arith.mulf %cst_58, %46 : f32
    %170 = arith.addf %168, %169 : f32
    %cst_59 = arith.constant 1.000000e-01 : f32
    %171 = arith.mulf %cst_59, %115 : f32
    %172 = arith.addf %170, %171 : f32
    %cst_60 = arith.constant 8.000000e-02 : f32
    %173 = arith.mulf %cst_60, %116 : f32
    %174 = arith.addf %172, %173 : f32
    %cst_61 = arith.constant 2.000000e-02 : f32
    %175 = arith.mulf %cst_61, %163 : f32
    %cst_62 = arith.constant 5.000000e-03 : f32
    %176 = arith.mulf %cst_62, %117 : f32
    %177 = arith.addf %175, %176 : f32
    %cst_63 = arith.constant 0.949999988 : f32
    %178 = arith.mulf %cst_63, %174 : f32
    %179 = arith.subf %178, %177 : f32
    %cst_64 = arith.constant 0.000000e+00 : f32
    %180 = arith.subf %cst_64, %179 : f32
    %c0_65 = arith.constant 0 : index
    %c0_66 = arith.constant 0 : index
    %181 = memref.load %arg2[%c0_65, %c0_66] : memref<1x1xf32, #tpu.memory_space<smem>>
    memref.store %180, %arg2[%c0_65, %c0_66] : memref<1x1xf32, #tpu.memory_space<smem>>
    return
  }
}

</mosaic_0001>

<bundles_post_ra>
// kernel: tpu_custom_call.1
= control target key start
LH: loop header
LB: loop body
LE: loop exit
PB: predicated region body
PF: predicated region fallthrough
CT: control target
= control target key end

     0   :  { %7 = vsyncpa [#allocation3], 0  ;;  %s668_s0 = inlined_call_operand.hbm [shape: f32[8,16], index: 0, kind: input, shape index: {}]   ;;  %s669_s1 = inlined_call_operand.hbm [shape: f32[8,16], index: 1, kind: input, shape index: {}]   ;;  %s670_s2 = inlined_call_operand.hbm [shape: f32[1,1], index: 2, kind: output, shape index: {}]  }
   0x1   :  { %8 = vsyncpa [#allocation6], 0 }
   0x2   :  { %9 = vsyncpa [#allocation4], 0  ;;  %s517_s9 = smov [#allocation2]   ;;  %s518_s11 = smov [#allocation5]  }
   0x3   :  { %s16_s10 = sshll.u32 %s517_s9, 4  ;;  %s26_s12 = sshll.u32 %s518_s11, 4  ;;  %s17_s10 = int_to_ptr.vmem [resolvable:$true] %s16_s10  ;;  %s27_s12 = int_to_ptr.vmem [resolvable:$true] %s26_s12 }
   0x4   :  { %s457_s15 = scalar_lea.hbm %s668_s0, 128 }
   0x5   :  { %p458_p0 = scmp.ne.s32.totalorder %s668_s0, %s457_s15  ;;  %p461_p1 = scmp.lt.u32.totalorder %s457_s15, %s668_s0 }
   0x7   :  { %p463_p2 = pnand %p461_p1, %p458_p0 }
   0x9   :  { %466 = shalt.err (!%p463_p2)
}
   0xa   :  { %s467_s20 = scalar_lea.vmem %s17_s10, 128  ;;  %p472_p4 = scmp.lt.s32.totalorder %s17_s10, %s17_s10 }
   0xb   :  { %p468_p3 = scmp.ne.s32.totalorder %s17_s10, %s467_s20  ;;  %p473_p5 = scmp.lt.s32.totalorder %s467_s20, %s467_s20 }
   0xd   :  { %p474_p6 = por %p473_p5, %p472_p4 }
   0xf   :  { %p475_p7 = pnand %p474_p6, %p468_p3 }
  0x11   :  { %478 = shalt.err (!%p475_p7)
}
  0x12   :  { %19 = dma.hbm_to_vmem [thread:$0]  %s668_s0, 128, %s17_s10, [#allocation3]  }
  0x13   :  { %s479_s25 = scalar_lea.hbm %s669_s1, 128 }
  0x14   :  { %p480_p8 = scmp.ne.s32.totalorder %s669_s1, %s479_s25  ;;  %p483_p9 = scmp.lt.u32.totalorder %s479_s25, %s669_s1 }
  0x16   :  { %p485_p10 = pnand %p483_p9, %p480_p8 }
  0x18   :  { %488 = shalt.err (!%p485_p10)
}
  0x19   :  { %s489_s30 = scalar_lea.vmem %s27_s12, 128  ;;  %p494_p12 = scmp.lt.s32.totalorder %s27_s12, %s27_s12 }
  0x1a   :  { %p490_p11 = scmp.ne.s32.totalorder %s27_s12, %s489_s30  ;;  %p495_p13 = scmp.lt.s32.totalorder %s489_s30, %s489_s30 }
  0x1c   :  { %p496_p0 = por %p495_p13, %p494_p12 }
  0x1e   :  { %p497_p1 = pnand %p496_p0, %p490_p11 }
  0x20   :  { %500 = shalt.err (!%p497_p1)
}
  0x21   :  { %29 = dma.hbm_to_vmem [thread:$0]  %s669_s1, 128, %s27_s12, [#allocation6]  }
  0x22   :  { %511 = dma.done.wait [#allocation3], 128  }
  0x23   :  { %512 = vsyncadd [#allocation3], 4294967168 }
  0x24   :  { %513 = dma.done.wait [#allocation6], 128  }
  0x25   :  { %514 = vsyncadd [#allocation6], 4294967168  ;;  %v36_v0 = vld [vmem:[#allocation2] sm:$0xff]  ;;  %v37_v1 = vld [vmem:[#allocation5] sm:$0xff]  ;;  %vm40_vm0 = vcmask 130048   ;;  %s519_s1 = smov 1  }
  0x26   :  { %451 = vtanh.f32 %v36_v0  ;;  %s520_s4 = smov 15   ;;  %s521_s5 = smov 113   ;;  %v522_v15 = vmov 0.0   ;;  %vm205_vm2 = vcmask 6144   ;;  %vm139_vm6 = vcmask 121856  }
  0x27   :  { %s523_s6 = smov 127   ;;  %s524_s14 = smov 0.0  }
  0x30   :  { %v565_v2 = vpop.eup %451 }
  0x31   :  { %v568_v3 = vmul.f32 %v565_v2, %v37_v1  ;;  %v237_v9 = vrot.slane %v565_v2, 7 }
  0x33   :  { %v41_v4 = vsel %vm40_vm0, %v568_v3, 0.0  ;;  %v51_v5 = vmul.f32 %v568_v3, %v568_v3  ;;  %151 = vrot.lane.b32.xlu1 %v568_v3, %s519_s1  ;;  %v192_v6 = vrot.slane %v568_v3, 1  ;;  %v217_v8 = vrot.slane %v568_v3, 7 }
  0x34   :  { %42 = vadd.xlane.f32.xlu0 %v41_v4  ;;  %v62_v10 = vand.u32 2147483647, %v568_v3  ;;  %v405_v11 = vadd.f32 -0.01, %v568_v3  ;;  %vm73_vm1 = vcmp.gt.f32.partialorder %v568_v3, 0.0 }
  0x35   :  { %v52_v7 = vsel %vm40_vm0, %v51_v5, 0.0  ;;  %v74_v16 = vsel %vm73_vm1, 1.0, %v522_v15 }
  0x36   :  { %v63_v12 = vsel %vm40_vm0, %v62_v10, 0.0  ;;  %v86_v13 = vmax.f32 %v405_v11, 0.0  ;;  %v75_v17 = vsel %vm40_vm0, %v74_v16, 0.0 }
  0x37   :  { %193 = vrot.lane.b32.xlu1 %v192_v6, %s520_s4 }
  0x38   :  { %53 = vadd.xlane.f32.xlu0 %v52_v7  ;;  %v87_v14 = vsel %vm40_vm0, %v86_v13, 0.0 }
  0x3b   :  { %218 = vrot.lane.b32.xlu1 %v217_v8, %s521_s5 }
  0x3f   :  { %238 = vrot.lane.b32.xlu1 %v237_v9, %s521_s5 }
  0x4e   :  { %172 = vrot.lane.b32.xlu0 %v565_v2, %s519_s1 }
  0x63   :  { %64 = vadd.xlane.f32.xlu1 %v63_v12 }
  0x67   :  { %88 = vadd.xlane.f32.xlu1 %v87_v14 }
  0x6d   :  { %76 = vadd.xlane.f32.xlu0 %v75_v17 }
  0x78   :  { %131 = vrot.lane.b32.xlu1 %v568_v3, %s523_s6 }
  0xa5   :  { %v152_v18 = vpop.permute.xlu1 %151 }
  0xa6   :  { %v154_v19 = vsub.f32 %v568_v3, %v152_v18 }
  0xa8   :  { %v155_v20 = vmax.f32 %v154_v19, 0.0 }
  0xa9   :  { %v194_v21 = vpop.permute.xlu1 %193 }
  0xaa   :  { %157 = vrot.lane.b32.xlu0 %v155_v20, %s523_s6  ;;  %v196_v30 = vmul.f32 %v194_v21, %v568_v3 }
  0xac   :  { %vm198_vm3 = vcmp.lt.f32.partialorder %v196_v30, 0.0  ;;  %vm197_vm4 = vcmp.gt.f32.partialorder %v196_v30, 0.0 }
  0xad   :  { %v219_v22 = vpop.permute.xlu1 %218  ;;  %v199_v43 = vsel %vm198_vm3, -1.0, %v522_v15 }
  0xae   :  { %v221_v23 = vsub.f32 %v568_v3, %v219_v22  ;;  %v200_v45 = vsel %vm197_vm4, 1.0, %v199_v43 }
  0xb0   :  { %v222_v24 = vmax.f32 %v221_v23, 0.0 }
  0xb1   :  { %v239_v47 = vpop.permute.xlu1 %238 }
  0xb2   :  { %v224_v27 = vrot.slane %v222_v24, 1  ;;  %v241_v18 = vsub.f32 %v565_v2, %v239_v47 }
  0xb4   :  { %v226_v33 = vsel %vm205_vm2, %v224_v27, 0.0  ;;  %v242_v20 = vand.u32 2147483647, %v241_v18  ;;  %v272_v27 = vsel %vm40_vm0, %v568_v3, inf }
  0xb6   :  { %v244_v24 = vrot.slane %v242_v20, 1 }
  0xc1   :  { %v43_v25 = vpop.xlane.xlu0 %42 }
  0xc2   :  { %v44_v26 = vrot.slane %v43_v25, 4 }
  0xc4   :  { %v45_v28 = vadd.f32 %v44_v26, %v43_v25 }
  0xc5   :  { %v54_v29 = vpop.xlane.xlu0 %53 }
  0xc6   :  { %v46_v31 = vrot.slane %v45_v28, 2  ;;  %v55_v32 = vrot.slane %v54_v29, 4 }
  0xc8   :  { %v56_v34 = vadd.f32 %v55_v32, %v54_v29  ;;  %v47_v35 = vadd.f32 %v46_v31, %v45_v28 }
  0xc9   :  { %v173_v36 = vpop.permute.xlu0 %172  ;;  %227 = vadd.xlane.f32.xlu0 %v226_v33 }
  0xca   :  { %v57_v37 = vrot.slane %v56_v34, 2  ;;  %v175_v38 = vsub.f32 %v565_v2, %v173_v36  ;;  %v48_v39 = vrot.slane %v47_v35, 1  ;;  %v246_v2 = vsel %vm205_vm2, %v244_v24, 0.0 }
  0xcc   :  { %v176_v40 = vand.u32 2147483647, %v175_v38  ;;  %v49_v41 = vadd.f32 %v48_v39, %v47_v35  ;;  %v58_v42 = vadd.f32 %v57_v37, %v56_v34 }
  0xce   :  { %406 = vpush %v49_v41  ;;  %178 = vrot.lane.b32.xlu1 %v176_v40, %s523_s6  ;;  %v59_v44 = vrot.slane %v58_v42, 1 }
  0xd0   :  { %v60_v46 = vadd.f32 %v59_v44, %v58_v42 }
  0xd2   :  { %408 = vpush %v60_v46  ;;  %202 = vrot.lane.b32.xlu1 %v200_v45, %s521_s5 }
  0xf0   :  { %v65_v48 = vpop.xlane.xlu1 %64 }
  0xf1   :  { %v66_v49 = vrot.slane %v65_v48, 4 }
  0xf3   :  { %v67_v50 = vadd.f32 %v66_v49, %v65_v48 }
  0xf4   :  { %v89_v51 = vpop.xlane.xlu1 %88 }
  0xf5   :  { %v68_v52 = vrot.slane %v67_v50, 2  ;;  %v90_v53 = vrot.slane %v89_v51, 4 }
  0xf7   :  { %v91_v54 = vadd.f32 %v90_v53, %v89_v51  ;;  %v69_v55 = vadd.f32 %v68_v52, %v67_v50 }
  0xf8   :  { %v132_v56 = vpop.permute.xlu1 %131 }
  0xf9   :  { %v92_v57 = vrot.slane %v91_v54, 2  ;;  %v70_v58 = vrot.slane %v69_v55, 1  ;;  %v134_v59 = vmul.f32 %v132_v56, %v568_v3 }
  0xfa   :  { %v77_v60 = vpop.xlane.xlu0 %76 }
  0xfb   :  { %v78_v61 = vrot.slane %v77_v60, 4  ;;  %v71_v62 = vadd.f32 %v70_v58, %v69_v55  ;;  %vm136_vm5 = vcmp.lt.f32.partialorder %v134_v59, 0.0  ;;  %v93_v63 = vadd.f32 %v92_v57, %v91_v54 }
  0xfc   :  { %vm135_vm7 = vcmp.gt.f32.partialorder %v134_v59, 0.0  ;;  %v137_v0 = vsel %vm136_vm5, -1.0, %v522_v15 }
  0xfd   :  { %v79_v1 = vadd.f32 %v78_v61, %v77_v60  ;;  %410 = vpush %v71_v62  ;;  %v138_v4 = vsel %vm135_vm7, 1.0, %v137_v0  ;;  %v94_v7 = vrot.slane %v93_v63, 1 }
  0xfe   :  { %v140_v5 = vsel %vm139_vm6, %v138_v4, 0.0 }
  0xff   :  { %s407_s7 = spop %406  ;;  %v80_v6 = vrot.slane %v79_v1, 2  ;;  %141 = vadd.xlane.f32.xlu1 %v140_v5  ;;  %v95_v10 = vadd.f32 %v94_v7, %v93_v63 }
 0x100   :  { %s603_s8 = smul.f32 0.0078125, %s407_s7 }
 0x101   :  { %v81_v8 = vadd.f32 %v80_v6, %v79_v1 }
 0x102   :  { %s100_s9 = smul.f32 128.0, %s603_s8 }
 0x103   :  { %v82_v9 = vrot.slane %v81_v8, 1  ;;  %s409_s11 = spop %408 }
 0x104   :  { %s101_s10 = smul.f32 %s100_s9, %s603_s8 }
 0x105   :  { %v83_v11 = vadd.f32 %v82_v9, %v81_v8 }
 0x106   :  { %s102_s12 = ssub.f32 %s409_s11, %s101_s10 }
 0x107   :  { %412 = vpush %v83_v11 }
 0x108   :  { %s105_s13 = smul.f32 0.007874016, %s102_s12  ;;  %414 = vpush %v95_v10 }
 0x10a   :  { %s106_s15 = smax.f32 %s524_s14, %s105_s13 }
 0x10b   :  { %v107_v12 = vstv %s106_s15 }
 0x10c   :  { %453 = vrsqrt.f32 %v107_v12  ;;  %vm110_vm8 = vcmp.eq.f32.partialorder %v107_v12, inf  ;;  %v113_v15 = vand.u32 2147483648, %v107_v12  ;;  %vm112_vm9 = vcmp.eq.f32.partialorder %v107_v12, 0.0 }
 0x116   :  { %v454_v13 = vpop.eup %453 }
 0x117   :  { %v109_v14 = vmul.f32 %v454_v13, %v107_v12 }
 0x119   :  { %v111_v16 = vsel %vm110_vm8, %v107_v12, %v109_v14 }
 0x11a   :  { %v114_v17 = vsel %vm112_vm9, %v113_v15, %v111_v16 }
 0x11b   :  { %416 = vpush %v114_v17  ;;  %v266_v17 = vlaneseq }
 0x11c   :  { %v158_v22 = vpop.permute.xlu0 %157 }
 0x11d   :  { %v160_v26 = vsel %vm139_vm6, %v158_v22, 0.0  ;;  %v267_v18 = vshrl.u32 %v266_v17, 7 }
 0x11f   :  { %v270_v20 = vmul.u32 16, %v267_v18 }
 0x12e   :  { %s411_s16 = spop %410 }
 0x12f   :  { %s123_s21 = smul.f32 0.0078125, %s411_s16 }
 0x131   :  { %s372_s22 = smul.f32 0.35, %s123_s21 }
 0x138   :  { %s413_s17 = spop %412 }
 0x139   :  { %s415_s18 = spop %414  ;;  %s126_s23 = smul.f32 0.0078125, %s413_s17 }
 0x13a   :  { %s129_s26 = smul.f32 0.0078125, %s415_s18 }
 0x13b   :  { %s374_s28 = smul.f32 0.2, %s126_s23 }
 0x13c   :  { %s615_s30 = smul.f32 0.15, %s129_s26 }
 0x140   :  { %v179_v19 = vpop.permute.xlu1 %178 }
 0x141   :  { %v181_v21 = vsel %vm139_vm6, %v179_v19, 0.0  ;;  %v269_v19 = vand.u32 127, %v266_v17 }
 0x142   :  { %182 = vadd.xlane.f32.xlu0 %v181_v21 }
 0x143   :  { %v627_v21 = vadd.s32 %v270_v20, %v269_v19 }
 0x144   :  { %v203_v23 = vpop.permute.xlu1 %202 }
 0x145   :  { %v206_v25 = vsel %vm205_vm2, %v203_v23, 0.0 }
 0x146   :  { %207 = vadd.xlane.f32.xlu1 %v206_v25  ;;  %161 = vadd.xlane.f32.xlu0 %v160_v26 }
 0x14a   :  { %247 = vadd.xlane.f32.xlu1 %v246_v2  ;;  %273 = vmin.xlane.f32.xlu0 %v272_v27 }
 0x14c   :  { %s417_s19 = spop %416 }
 0x14d   :  { %s116_s20 = sadd.f32 1e-08, %s417_s19 }
 0x14f   :  { %v117_v28 = vstv %s116_s20 }
 0x150   :  { %455 = vrcp.f32 %v117_v28 }
 0x156   :  { %v228_v37 = vpop.xlane.xlu0 %227 }
 0x157   :  { %v229_v38 = vrot.slane %v228_v37, 4 }
 0x159   :  { %v230_v41 = vadd.f32 %v229_v38, %v228_v37 }
 0x15a   :  { %v456_v29 = vpop.eup %455 }
 0x15b   :  { %418 = vpush %v456_v29  ;;  %v231_v48 = vrot.slane %v230_v41, 2 }
 0x15d   :  { %v232_v58 = vadd.f32 %v231_v48, %v230_v41 }
 0x15f   :  { %v233_v6 = vrot.slane %v232_v58, 1 }
 0x161   :  { %v234_v14 = vadd.f32 %v233_v6, %v232_v58 }
 0x18c   :  { %s419_s24 = spop %418  ;;  %v142_v30 = vpop.xlane.xlu1 %141 }
 0x18d   :  { %s120_s25 = smul.f32 %s419_s24, %s603_s8  ;;  %v143_v31 = vrot.slane %v142_v30, 4 }
 0x18f   :  { %s371_s27 = smul.f32 0.25, %s120_s25  ;;  %v144_v32 = vadd.f32 %v143_v31, %v142_v30 }
 0x191   :  { %s373_s29 = sadd.f32 %s372_s22, %s371_s27  ;;  %v145_v33 = vrot.slane %v144_v32, 2 }
 0x193   :  { %s617_s0 = sadd.f32 %s374_s28, %s373_s29  ;;  %v146_v34 = vadd.f32 %v145_v33, %v144_v32 }
 0x195   :  { %v147_v35 = vrot.slane %v146_v34, 1  ;;  %s377_s3 = sadd.f32 %s615_s30, %s617_s0 }
 0x197   :  { %v148_v36 = vadd.f32 %v147_v35, %v146_v34 }
 0x199   :  { %420 = vpush %v148_v36 }
 0x1ca   :  { %s421_s1 = spop %420 }
 0x1cf   :  { %v183_v39 = vpop.xlane.xlu0 %182 }
 0x1d0   :  { %v184_v40 = vrot.slane %v183_v39, 4 }
 0x1d2   :  { %v185_v42 = vadd.f32 %v184_v40, %v183_v39 }
 0x1d3   :  { %v208_v43 = vpop.xlane.xlu1 %207  ;;  %v162_v44 = vpop.xlane.xlu0 %161 }
 0x1d4   :  { %v186_v45 = vrot.slane %v185_v42, 2  ;;  %v209_v46 = vrot.slane %v208_v43, 4  ;;  %v163_v47 = vrot.slane %v162_v44, 4 }
 0x1d6   :  { %v210_v49 = vadd.f32 %v209_v46, %v208_v43  ;;  %v164_v50 = vadd.f32 %v163_v47, %v162_v44  ;;  %v187_v53 = vadd.f32 %v186_v45, %v185_v42 }
 0x1d7   :  { %v248_v51 = vpop.xlane.xlu1 %247  ;;  %v274_v52 = vpop.xlane.xlu0 %273 }
 0x1d8   :  { %v211_v54 = vrot.slane %v210_v49, 2  ;;  %v165_v55 = vrot.slane %v164_v50, 2  ;;  %v249_v56 = vrot.slane %v248_v51, 4  ;;  %v275_v57 = vrot.slane %v274_v52, 4 }
 0x1d9   :  { %v188_v63 = vrot.slane %v187_v53, 1 }
 0x1da   :  { %v250_v59 = vadd.f32 %v249_v56, %v248_v51  ;;  %v276_v60 = vmin.f32 %v274_v52, %v275_v57  ;;  %v166_v61 = vadd.f32 %v165_v55, %v164_v50  ;;  %v212_v62 = vadd.f32 %v211_v54, %v210_v49 }
 0x1db   :  { %v189_v11 = vadd.f32 %v188_v63, %v187_v53 }
 0x1dc   :  { %v251_v0 = vrot.slane %v250_v59, 2  ;;  %v277_v1 = vrot.slane %v276_v60, 2  ;;  %v167_v4 = vrot.slane %v166_v61, 1  ;;  %v213_v5 = vrot.slane %v212_v62, 1 }
 0x1de   :  { %v168_v7 = vadd.f32 %v167_v4, %v166_v61  ;;  %v214_v8 = vadd.f32 %v213_v5, %v212_v62  ;;  %v252_v9 = vadd.f32 %v251_v0, %v250_v59  ;;  %v278_v10 = vmin.f32 %v276_v60, %v277_v1 }
 0x1e0   :  { %422 = vpush %v168_v7  ;;  %v253_v12 = vrot.slane %v252_v9, 1  ;;  %v279_v13 = vrot.slane %v278_v10, 1 }
 0x1e1   :  { %424 = vpush %v189_v11 }
 0x1e2   :  { %426 = vpush %v214_v8  ;;  %v254_v15 = vadd.f32 %v253_v12, %v252_v9  ;;  %v280_v16 = vmin.f32 %v278_v10, %v279_v13 }
 0x1e3   :  { %428 = vpush %v234_v14 }
 0x1e4   :  { %430 = vpush %v254_v15 }
 0x1e5   :  { %432 = vpush %v280_v16 }
 0x211   :  { %s423_s4 = spop %422 }
 0x212   :  { %s621_s5 = spop %424 }
 0x213   :  { %s427_s6 = spop %426 }
 0x214   :  { %s216_s7 = sadd.f32 %s427_s6, %s421_s1  ;;  %s429_s8 = spop %428 }
 0x215   :  { %s236_s9 = sadd.f32 %s429_s8, %s423_s4  ;;  %s623_s10 = spop %430 }
 0x216   :  { %s259_s11 = smul.f32 0.007874016, %s216_s7  ;;  %s256_s12 = sadd.f32 %s623_s10, %s621_s5 }
 0x217   :  { %s262_s13 = smul.f32 0.007874016, %s236_s9  ;;  %s629_s14 = spop %432 }
 0x218   :  { %s378_s15 = smul.f32 0.1, %s259_s11  ;;  %v283_v22 = vstv %s629_s14  ;;  %s501_s7 = scalar_lea.hbm %s670_s2, 16 }
 0x219   :  { %vm284_vm10 = vcmp.eq.f32.partialorder %v568_v3, %v283_v22  ;;  %s380_s17 = smul.f32 0.08, %s262_s13  ;;  %p502_p2 = scmp.ne.s32.totalorder %s670_s2, %s501_s7 }
 0x21a   :  { %s379_s16 = sadd.f32 %s378_s15, %s377_s3  ;;  %v285_v23 = vsel %vm284_vm10, %v627_v21, 128  ;;  %s265_s25 = smul.f32 0.007874016, %s256_s12 }
 0x21b   :  { %v286_v24 = vsel %vm40_vm0, %v285_v23, 2147483647  ;;  %p505_p3 = scmp.lt.u32.totalorder %s501_s7, %s670_s2 }
 0x21c   :  { %s638_s18 = sadd.f32 %s380_s17, %s379_s16  ;;  %v288_v25 = vshra.s32 %v286_v24, 16  ;;  %v287_v27 = vand.u32 65535, %v286_v24  ;;  %s383_s28 = smul.f32 0.005, %s265_s25 }
 0x21d   :  { %p507_p4 = pnand %p505_p3, %p502_p2 }
 0x21e   :  { %v290_v26 = vcvt.s32.f32 %v288_v25  ;;  %v289_v28 = vcvt.s32.f32 %v287_v27  ;;  %s385_s30 = smul.f32 0.95, %s638_s18 }
 0x220   :  { %291 = vmin.xlane.f32.xlu1 %v290_v26 }
 0x2ad   :  { %v292_v2 = vpop.xlane.xlu1 %291 }
 0x2ae   :  { %vm293_vm11 = vcmp.eq.f32.partialorder %v290_v26, %v292_v2  ;;  %v298_v30 = vcvt.f32.s32 %v292_v2 }
 0x2af   :  { %v294_v29 = vsel %vm293_vm11, %v289_v28, inf }
 0x2b0   :  { %295 = vmin.xlane.f32.xlu0 %v294_v29  ;;  %v299_v32 = vshll.u32 %v298_v30, 16 }
 0x33d   :  { %v296_v31 = vpop.xlane.xlu0 %295 }
 0x33e   :  { %v297_v33 = vcvt.f32.s32 %v296_v31 }
 0x340   :  { %v300_v34 = vadd.s32 %v299_v32, %v297_v33 }
 0x342   :  { %v301_v35 = vrot.slane %v300_v34, 4 }
 0x344   :  { %vm302_vm12 = vcmp.lt.s32.totalorder %v300_v34, %v301_v35 }
 0x345   :  { %v303_v36 = vsel %vm302_vm12, %v300_v34, %v301_v35 }
 0x346   :  { %v304_v37 = vrot.slane %v303_v36, 2 }
 0x348   :  { %vm305_vm13 = vcmp.lt.s32.totalorder %v303_v36, %v304_v37 }
 0x349   :  { %v306_v38 = vsel %vm305_vm13, %v303_v36, %v304_v37 }
 0x34a   :  { %v307_v39 = vrot.slane %v306_v38, 1 }
 0x34c   :  { %vm308_vm14 = vcmp.lt.s32.totalorder %v306_v38, %v307_v39 }
 0x34d   :  { %v309_v40 = vsel %vm308_vm14, %v306_v38, %v307_v39 }
 0x34e   :  { %434 = vpush %v309_v40 }
 0x37f   :  { %s435_s19 = spop %434 }
 0x380   :  { %v311_v41 = vstv %s435_s19 }
 0x381   :  { %vm312_vm15 = vcmp.eq.s32.totalorder %v627_v21, %v311_v41 }
 0x382   :  { %v313_v42 = vsel %vm312_vm15, 3e+38, %v568_v3 }
 0x383   :  { %v314_v43 = vsel %vm40_vm0, %v313_v42, inf }
 0x384   :  { %315 = vmin.xlane.f32.xlu1 %v314_v43 }
 0x411   :  { %v316_v44 = vpop.xlane.xlu1 %315 }
 0x412   :  { %v317_v45 = vrot.slane %v316_v44, 4 }
 0x414   :  { %v318_v46 = vmin.f32 %v316_v44, %v317_v45 }
 0x416   :  { %v319_v47 = vrot.slane %v318_v46, 2 }
 0x418   :  { %v320_v48 = vmin.f32 %v318_v46, %v319_v47 }
 0x41a   :  { %v321_v49 = vrot.slane %v320_v48, 1 }
 0x41c   :  { %v322_v50 = vmin.f32 %v320_v48, %v321_v49 }
 0x41e   :  { %436 = vpush %v322_v50 }
 0x44f   :  { %s643_s20 = spop %436 }
 0x450   :  { %v325_v51 = vstv %s643_s20  ;;  %s324_s22 = sadd.f32 %s643_s20, %s629_s14 }
 0x451   :  { %vm326_vm1 = vcmp.eq.f32.partialorder %v313_v42, %v325_v51 }
 0x452   :  { %v327_v52 = vsel %vm326_vm1, %v627_v21, 128 }
 0x453   :  { %v328_v3 = vsel %vm40_vm0, %v327_v52, 2147483647 }
 0x454   :  { %v330_v53 = vshra.s32 %v328_v3, 16  ;;  %v329_v55 = vand.u32 65535, %v328_v3 }
 0x456   :  { %v332_v54 = vcvt.s32.f32 %v330_v53  ;;  %v331_v57 = vcvt.s32.f32 %v329_v55 }
 0x458   :  { %333 = vmin.xlane.f32.xlu0 %v332_v54 }
 0x4e5   :  { %v334_v56 = vpop.xlane.xlu0 %333 }
 0x4e6   :  { %vm335_vm2 = vcmp.eq.f32.partialorder %v332_v54, %v334_v56  ;;  %v340_v59 = vcvt.f32.s32 %v334_v56 }
 0x4e7   :  { %v336_v58 = vsel %vm335_vm2, %v331_v57, inf }
 0x4e8   :  { %337 = vmin.xlane.f32.xlu1 %v336_v58  ;;  %v341_v61 = vshll.u32 %v340_v59, 16 }
 0x575   :  { %v338_v60 = vpop.xlane.xlu1 %337 }
 0x576   :  { %v339_v62 = vcvt.f32.s32 %v338_v60 }
 0x578   :  { %v342_v63 = vadd.s32 %v341_v61, %v339_v62 }
 0x57a   :  { %v343_v0 = vrot.slane %v342_v63, 4 }
 0x57c   :  { %vm344_vm3 = vcmp.lt.s32.totalorder %v342_v63, %v343_v0 }
 0x57d   :  { %v345_v1 = vsel %vm344_vm3, %v342_v63, %v343_v0 }
 0x57e   :  { %v346_v4 = vrot.slane %v345_v1, 2 }
 0x580   :  { %vm347_vm4 = vcmp.lt.s32.totalorder %v345_v1, %v346_v4 }
 0x581   :  { %v348_v5 = vsel %vm347_vm4, %v345_v1, %v346_v4 }
 0x582   :  { %v349_v6 = vrot.slane %v348_v5, 1 }
 0x584   :  { %vm350_vm5 = vcmp.lt.s32.totalorder %v348_v5, %v349_v6 }
 0x585   :  { %v351_v7 = vsel %vm350_vm5, %v348_v5, %v349_v6 }
 0x586   :  { %438 = vpush %v351_v7 }
 0x5b7   :  { %s439_s21 = spop %438 }
 0x5b8   :  { %v353_v8 = vstv %s439_s21 }
 0x5b9   :  { %vm354_vm6 = vcmp.eq.s32.totalorder %v627_v21, %v353_v8 }
 0x5ba   :  { %v355_v9 = vsel %vm354_vm6, 3e+38, %v313_v42 }
 0x5bb   :  { %v356_v10 = vsel %vm40_vm0, %v355_v9, inf }
 0x5bc   :  { %357 = vmin.xlane.f32.xlu0 %v356_v10 }
 0x649   :  { %v358_v11 = vpop.xlane.xlu0 %357 }
 0x64a   :  { %v359_v12 = vrot.slane %v358_v11, 4 }
 0x64c   :  { %v360_v13 = vmin.f32 %v358_v11, %v359_v12 }
 0x64e   :  { %v361_v14 = vrot.slane %v360_v13, 2 }
 0x650   :  { %v362_v15 = vmin.f32 %v360_v13, %v361_v14 }
 0x652   :  { %v363_v16 = vrot.slane %v362_v15, 1 }
 0x654   :  { %v364_v17 = vmin.f32 %v362_v15, %v363_v16 }
 0x656   :  { %440 = vpush %v364_v17 }
 0x687   :  { %s441_s23 = spop %440 }
 0x688   :  { %s366_s24 = sadd.f32 %s441_s23, %s324_s22 }
 0x68a   :  { %s367_s26 = ssub.f32 0.0, %s366_s24 }
 0x68c   :  { %s370_s27 = smul.f32 0.33333334, %s367_s26 }
 0x68e   :  { %s382_s29 = smul.f32 0.02, %s370_s27 }
 0x690   :  { %s384_s0 = sadd.f32 %s383_s28, %s382_s29 }
 0x692   :  { %s386_s3 = ssub.f32 %s385_s30, %s384_s0 }
 0x694   :  { %s387_s1 = ssub.f32 0.0, %s386_s3 }
 0x696   :  { %389 = sst [smem:[#allocation7]] %s387_s1 }
 0x697   :  { %510 = shalt.err (!%p507_p4)
}
 0x698   :  { %s525_s10 = smov [#allocation7]  }
 0x699   :  { %397 = dma.smem_to_hbm %s525_s10, 16, %s670_s2, [#allocation4]  }
 0x69a   :  { %515 = dma.done.wait [#allocation4], 16  }
 0x69b   :  { %516 = vsyncadd [#allocation4], 4294967280 }
 0x69c   :  { %401 = sfence }
 0x69d   :  { %402 = vsyncpa [#allocation3], 1 }
 0x69e   :  { %403 = vsyncpa [#allocation6], 1 }
 0x69f   :  { %404 = vsyncpa [#allocation4], 1 }

</bundles_post_ra>
